<compile_context>
chip_gen: v7x
topology: tpu7x:2x2x1
jax: 0.10.0
libtpu: 0.0.40
codegen_flags: <defaults>
</compile_context>

<pallas_src>
import jax
import jax.numpy as jnp
from jax.experimental import pallas as pl
from jax.experimental.pallas import tpu as pltpu


def _add_kernel(a_ref, b_ref, o_ref):
    # Whole tiles already resident in VMEM; single VPU elementwise add.
    o_ref[...] = a_ref[...] + b_ref[...]


def pallas_add(x134: jax.Array, x148: jax.Array) -> jax.Array:
    assert x134.shape == x148.shape and x134.dtype == x148.dtype
    orig_shape = x134.shape

    # Flatten leading dims so the last (channel) dim maps to the 128-wide lane
    # axis (384 = 3 * 128 -> unmasked, lane-dense loads/stores).
    rows = 1
    for d in orig_shape[:-1]:
        rows *= d
    cols = orig_shape[-1]
    a2 = x134.reshape(rows, cols)
    b2 = x148.reshape(rows, cols)

    itemsize = jnp.dtype(x134.dtype).itemsize
    out2 = pl.pallas_call(
        _add_kernel,
        out_shape=jax.ShapeDtypeStruct((rows, cols), x134.dtype),
        # Grid-less call: whole arrays as single VMEM blocks, no pipelining
        # machinery, no per-step sequencing overhead (correct at this size).
        in_specs=[
            pl.BlockSpec(memory_space=pltpu.MemorySpace.VMEM),
            pl.BlockSpec(memory_space=pltpu.MemorySpace.VMEM),
        ],
        out_specs=pl.BlockSpec(memory_space=pltpu.MemorySpace.VMEM),
        # Advisory cost so XLA schedules/overlaps this custom call sensibly.
        cost_estimate=pl.CostEstimate(
            flops=rows * cols,
            transcendentals=0,
            bytes_accessed=3 * rows * cols * itemsize,
        ),
    )(a2, b2)

    return out2.reshape(orig_shape)


if __name__ == "__main__":
    key = jax.random.PRNGKey(0)
    k1, k2 = jax.random.split(key)
    # Shapes consistent with the PyTorch module: [1, 14, 14, 384]
    x134 = jax.random.normal(k1, (1, 14, 14, 384), dtype=jnp.float32)
    x148 = jax.random.normal(k2, (1, 14, 14, 384), dtype=jnp.float32)

    ref = x134 + x148

    out = pallas_add(x134, x148)
    jax.block_until_ready(out)

    assert out.shape == (1, 14, 14, 384)
    assert out.dtype == jnp.float32
    assert jnp.allclose(out, ref, atol=1e-6, rtol=1e-6)

    print("KERNEL_OK")
</pallas_src>

<mosaic_0001>
module attributes {stable_mosaic.version = 11 : i64} {
  func.func @_add_kernel(%arg0: memref<196x384xf32, #tpu.memory_space<vmem>>, %arg1: memref<196x384xf32, #tpu.memory_space<vmem>>, %arg2: memref<196x384xf32, #tpu.memory_space<vmem>>) attributes {dimension_semantics = [], scalar_prefetch = 0 : i64, scratch_operands = 0 : i64, tpu.core_type = #tpu.core_type<tc>} {
    %c0 = arith.constant 0 : index
    %c0_0 = arith.constant 0 : index
    %0 = vector.load %arg0[%c0, %c0_0] : memref<196x384xf32, #tpu.memory_space<vmem>>, vector<196x384xf32>
    %c0_1 = arith.constant 0 : index
    %c0_2 = arith.constant 0 : index
    %1 = vector.load %arg1[%c0_1, %c0_2] : memref<196x384xf32, #tpu.memory_space<vmem>>, vector<196x384xf32>
    %2 = arith.addf %0, %1 : vector<196x384xf32>
    %c0_3 = arith.constant 0 : index
    %c0_4 = arith.constant 0 : index
    %3 = vector.load %arg2[%c0_3, %c0_4] : memref<196x384xf32, #tpu.memory_space<vmem>>, vector<196x384xf32>
    tpu.vector_store %arg2[%c0_3, %c0_4], %2 {strides = array<i32>} : memref<196x384xf32, #tpu.memory_space<vmem>>, vector<196x384xf32>,
    return
  }
}

</mosaic_0001>

<bundles_post_ra>
// kernel: tpu_custom_call.1
= control target key start
LH: loop header
LB: loop body
LE: loop exit
PB: predicated region body
PF: predicated region fallthrough
CT: control target
= control target key end

     0   :  { %7 = vsyncpa [#allocation3], 0  ;;  %s500_s0 = inlined_call_operand.hbm [shape: f32[196,384], index: 0, kind: input, shape index: {}]   ;;  %s501_s1 = inlined_call_operand.hbm [shape: f32[196,384], index: 1, kind: input, shape index: {}]   ;;  %s502_s2 = inlined_call_operand.hbm [shape: f32[196,384], index: 2, kind: output, shape index: {}]  }
   0x1   :  { %8 = vsyncpa [#allocation6], 0 }
   0x2   :  { %9 = vsyncpa [#allocation4], 0  ;;  %s435_s9 = smov [#allocation2]   ;;  %s363_s13 = scalar_lea.hbm %s500_s0, 9600 }
   0x3   :  { %s15_s10 = sshll.u32 %s435_s9, 4  ;;  %p364_p0 = scmp.ne.s32.totalorder %s500_s0, %s363_s13  ;;  %s16_s10 = int_to_ptr.vmem [resolvable:$true] %s15_s10 }
   0x4   :  { %p367_p1 = scmp.lt.u32.totalorder %s363_s13, %s500_s0 }
   0x6   :  { %p369_p2 = pnand %p367_p1, %p364_p0 }
   0x8   :  { %372 = shalt.err (!%p369_p2)
}
   0x9   :  { %s373_s18 = scalar_lea.vmem %s16_s10, 9600  ;;  %p378_p4 = scmp.lt.s32.totalorder %s16_s10, %s16_s10 }
   0xa   :  { %p374_p3 = scmp.ne.s32.totalorder %s16_s10, %s373_s18  ;;  %p379_p5 = scmp.lt.s32.totalorder %s373_s18, %s373_s18 }
   0xc   :  { %p380_p6 = por %p379_p5, %p378_p4 }
   0xe   :  { %p381_p7 = pnand %p380_p6, %p374_p3 }
  0x10   :  { %384 = shalt.err (!%p381_p7)
}
  0x11   :  { %s436_s19 = smov 384   ;;  %s437_s20 = smov 24  }
  0x12   :  { %21 = dma.hbm_to_vmem [thread:$0]  %s500_s0, 9600, %s16_s10, [#allocation3], %s436_s19, %s436_s19, %s437_s20  }
  0x13   :  { %s438_s23 = smov [#allocation5]   ;;  %s385_s27 = scalar_lea.hbm %s501_s1, 9600 }
  0x14   :  { %s27_s24 = sshll.u32 %s438_s23, 4  ;;  %p386_p8 = scmp.ne.s32.totalorder %s501_s1, %s385_s27  ;;  %s28_s24 = int_to_ptr.vmem [resolvable:$true] %s27_s24 }
  0x15   :  { %p389_p9 = scmp.lt.u32.totalorder %s385_s27, %s501_s1 }
  0x17   :  { %p391_p10 = pnand %p389_p9, %p386_p8 }
  0x19   :  { %394 = shalt.err (!%p391_p10)
}
  0x1a   :  { %s395_s4 = scalar_lea.vmem %s28_s24, 9600  ;;  %p400_p12 = scmp.lt.s32.totalorder %s28_s24, %s28_s24 }
  0x1b   :  { %p396_p11 = scmp.ne.s32.totalorder %s28_s24, %s395_s4  ;;  %p401_p13 = scmp.lt.s32.totalorder %s395_s4, %s395_s4 }
  0x1d   :  { %p402_p0 = por %p401_p13, %p400_p12 }
  0x1f   :  { %p403_p1 = pnand %p402_p0, %p396_p11 }
  0x21   :  { %406 = shalt.err (!%p403_p1)
}
  0x22   :  { %33 = dma.hbm_to_vmem [thread:$0]  %s501_s1, 9600, %s28_s24, [#allocation6], %s436_s19, %s436_s19, %s437_s20  }
  0x23   :  { %429 = dma.done.wait [#allocation3], 9600  }
  0x24   :  { %430 = vsyncadd [#allocation3], 4294957696 }
  0x25   :  { %431 = dma.done.wait [#allocation6], 9600  }
  0x26   :  { %432 = vsyncadd [#allocation6], 4294957696  ;;  %v40_v0 = vld [vmem:[#allocation2] sm:$0xff]  ;;  %v115_v1 = vld [vmem:[#allocation5] sm:$0xff]  ;;  %s439_s1 = smov [#allocation7]  }
  0x27   :  { %v41_v2 = vld [vmem:[#allocation2 + $0x8] sm:$0xff]  ;;  %v190_v3 = vadd.f32 %v115_v1, %v40_v0  ;;  %v116_v4 = vld [vmem:[#allocation5 + $0x8] sm:$0xff]  ;;  %v42_v5 = vld [vmem:[#allocation2 + $0x10] sm:$0xff]  ;;  %s345_s6 = sshll.u32 %s439_s1, 4  ;;  %s346_s6 = int_to_ptr.vmem [resolvable:$true] %s345_s6 }
  0x28   :  { %v117_v6 = vld [vmem:[#allocation5 + $0x10] sm:$0xff]  ;;  %v191_v7 = vadd.f32 %v116_v4, %v41_v2  ;;  %v43_v9 = vld [vmem:[#allocation2 + $0x18] sm:$0xff]  ;;  %v118_v10 = vld [vmem:[#allocation5 + $0x18] sm:$0xff]  ;;  %s407_s7 = scalar_lea.vmem %s346_s6, 9600  ;;  %p412_p3 = scmp.lt.s32.totalorder %s346_s6, %s346_s6 }
  0x29   :  { %v192_v8 = vadd.f32 %v117_v6, %v42_v5  ;;  %v44_v11 = vld [vmem:[#allocation2 + $0x20] sm:$0xff]  ;;  %265 = vst [vmem:[#allocation7] sm:$0xff] %v190_v3  ;;  %v193_v12 = vadd.f32 %v118_v10, %v43_v9  ;;  %v119_v13 = vld [vmem:[#allocation5 + $0x20] sm:$0xff]  ;;  %v45_v14 = vld [vmem:[#allocation2 + $0x28] sm:$0xff]  ;;  %p408_p2 = scmp.ne.s32.totalorder %s346_s6, %s407_s7  ;;  %p413_p4 = scmp.lt.s32.totalorder %s407_s7, %s407_s7 }
  0x2a   :  { %v120_v15 = vld [vmem:[#allocation5 + $0x28] sm:$0xff]  ;;  %266 = vst [vmem:[#allocation7 + $0x8] sm:$0xff] %v191_v7  ;;  %v194_v16 = vadd.f32 %v119_v13, %v44_v11  ;;  %v46_v18 = vld [vmem:[#allocation2 + $0x30] sm:$0xff]  ;;  %v121_v19 = vld [vmem:[#allocation5 + $0x30] sm:$0xff] }
  0x2b   :  { %267 = vst [vmem:[#allocation7 + $0x10] sm:$0xff] %v192_v8  ;;  %v195_v17 = vadd.f32 %v120_v15, %v45_v14  ;;  %v47_v20 = vld [vmem:[#allocation2 + $0x38] sm:$0xff]  ;;  %268 = vst [vmem:[#allocation7 + $0x18] sm:$0xff] %v193_v12  ;;  %v196_v21 = vadd.f32 %v121_v19, %v46_v18  ;;  %v122_v22 = vld [vmem:[#allocation5 + $0x38] sm:$0xff]  ;;  %p414_p5 = por %p413_p4, %p412_p3 }
  0x2c   :  { %v48_v23 = vld [vmem:[#allocation2 + $0x40] sm:$0xff]  ;;  %v123_v24 = vld [vmem:[#allocation5 + $0x40] sm:$0xff]  ;;  %269 = vst [vmem:[#allocation7 + $0x20] sm:$0xff] %v194_v16  ;;  %v197_v25 = vadd.f32 %v122_v22, %v47_v20  ;;  %v49_v27 = vld [vmem:[#allocation2 + $0x48] sm:$0xff] }
  0x2d   :  { %270 = vst [vmem:[#allocation7 + $0x28] sm:$0xff] %v195_v17  ;;  %v198_v26 = vadd.f32 %v123_v24, %v48_v23  ;;  %v124_v28 = vld [vmem:[#allocation5 + $0x48] sm:$0xff]  ;;  %v50_v29 = vld [vmem:[#allocation2 + $0x50] sm:$0xff]  ;;  %271 = vst [vmem:[#allocation7 + $0x30] sm:$0xff] %v196_v21  ;;  %p415_p6 = pnand %p414_p5, %p408_p2 }
  0x2e   :  { %v199_v30 = vadd.f32 %v124_v28, %v49_v27  ;;  %v125_v31 = vld [vmem:[#allocation5 + $0x50] sm:$0xff]  ;;  %v51_v32 = vld [vmem:[#allocation2 + $0x58] sm:$0xff]  ;;  %v126_v33 = vld [vmem:[#allocation5 + $0x58] sm:$0xff]  ;;  %272 = vst [vmem:[#allocation7 + $0x38] sm:$0xff] %v197_v25 }
  0x2f   :  { %273 = vst [vmem:[#allocation7 + $0x40] sm:$0xff] %v198_v26  ;;  %v200_v34 = vadd.f32 %v125_v31, %v50_v29  ;;  %v201_v35 = vadd.f32 %v126_v33, %v51_v32  ;;  %v52_v36 = vld [vmem:[#allocation2 + $0x60] sm:$0xff]  ;;  %v127_v37 = vld [vmem:[#allocation5 + $0x60] sm:$0xff]  ;;  %v53_v38 = vld [vmem:[#allocation2 + $0x68] sm:$0xff] }
  0x30   :  { %274 = vst [vmem:[#allocation7 + $0x48] sm:$0xff] %v199_v30  ;;  %v202_v39 = vadd.f32 %v127_v37, %v52_v36  ;;  %v128_v40 = vld [vmem:[#allocation5 + $0x68] sm:$0xff]  ;;  %v54_v41 = vld [vmem:[#allocation2 + $0x70] sm:$0xff]  ;;  %v129_v42 = vld [vmem:[#allocation5 + $0x70] sm:$0xff] }
  0x31   :  { %275 = vst [vmem:[#allocation7 + $0x50] sm:$0xff] %v200_v34  ;;  %276 = vst [vmem:[#allocation7 + $0x58] sm:$0xff] %v201_v35  ;;  %v203_v43 = vadd.f32 %v128_v40, %v53_v38  ;;  %v204_v44 = vadd.f32 %v129_v42, %v54_v41  ;;  %v55_v45 = vld [vmem:[#allocation2 + $0x78] sm:$0xff]  ;;  %v130_v46 = vld [vmem:[#allocation5 + $0x78] sm:$0xff] }
  0x32   :  { %v56_v47 = vld [vmem:[#allocation2 + $0x80] sm:$0xff]  ;;  %277 = vst [vmem:[#allocation7 + $0x60] sm:$0xff] %v202_v39  ;;  %v205_v48 = vadd.f32 %v130_v46, %v55_v45  ;;  %v131_v49 = vld [vmem:[#allocation5 + $0x80] sm:$0xff]  ;;  %v57_v50 = vld [vmem:[#allocation2 + $0x88] sm:$0xff] }
  0x33   :  { %v132_v51 = vld [vmem:[#allocation5 + $0x88] sm:$0xff]  ;;  %278 = vst [vmem:[#allocation7 + $0x68] sm:$0xff] %v203_v43  ;;  %279 = vst [vmem:[#allocation7 + $0x70] sm:$0xff] %v204_v44  ;;  %v206_v52 = vadd.f32 %v131_v49, %v56_v47  ;;  %v58_v54 = vld [vmem:[#allocation2 + $0x90] sm:$0xff] }
  0x34   :  { %v207_v53 = vadd.f32 %v132_v51, %v57_v50  ;;  %v133_v55 = vld [vmem:[#allocation5 + $0x90] sm:$0xff]  ;;  %v59_v56 = vld [vmem:[#allocation2 + $0x98] sm:$0xff]  ;;  %280 = vst [vmem:[#allocation7 + $0x78] sm:$0xff] %v205_v48  ;;  %v134_v58 = vld [vmem:[#allocation5 + $0x98] sm:$0xff] }
  0x35   :  { %v208_v57 = vadd.f32 %v133_v55, %v58_v54  ;;  %v60_v59 = vld [vmem:[#allocation2 + $0xa0] sm:$0xff]  ;;  %v135_v60 = vld [vmem:[#allocation5 + $0xa0] sm:$0xff]  ;;  %281 = vst [vmem:[#allocation7 + $0x80] sm:$0xff] %v206_v52  ;;  %v209_v61 = vadd.f32 %v134_v58, %v59_v56  ;;  %v61_v63 = vld [vmem:[#allocation2 + $0xa8] sm:$0xff] }
  0x36   :  { %282 = vst [vmem:[#allocation7 + $0x88] sm:$0xff] %v207_v53  ;;  %v210_v62 = vadd.f32 %v135_v60, %v60_v59  ;;  %v136_v0 = vld [vmem:[#allocation5 + $0xa8] sm:$0xff]  ;;  %v62_v1 = vld [vmem:[#allocation2 + $0xb0] sm:$0xff]  ;;  %v137_v3 = vld [vmem:[#allocation5 + $0xb0] sm:$0xff] }
  0x37   :  { %283 = vst [vmem:[#allocation7 + $0x90] sm:$0xff] %v208_v57  ;;  %v211_v2 = vadd.f32 %v136_v0, %v61_v63  ;;  %v63_v4 = vld [vmem:[#allocation2 + $0xb8] sm:$0xff]  ;;  %v138_v5 = vld [vmem:[#allocation5 + $0xb8] sm:$0xff]  ;;  %284 = vst [vmem:[#allocation7 + $0x98] sm:$0xff] %v209_v61  ;;  %v212_v6 = vadd.f32 %v137_v3, %v62_v1 }
  0x38   :  { %285 = vst [vmem:[#allocation7 + $0xa0] sm:$0xff] %v210_v62  ;;  %v213_v7 = vadd.f32 %v138_v5, %v63_v4  ;;  %v64_v8 = vld [vmem:[#allocation2 + $0xc0] sm:$0xff]  ;;  %v139_v9 = vld [vmem:[#allocation5 + $0xc0] sm:$0xff]  ;;  %v65_v10 = vld [vmem:[#allocation2 + $0xc8] sm:$0xff] }
  0x39   :  { %286 = vst [vmem:[#allocation7 + $0xa8] sm:$0xff] %v211_v2  ;;  %v214_v11 = vadd.f32 %v139_v9, %v64_v8  ;;  %v140_v12 = vld [vmem:[#allocation5 + $0xc8] sm:$0xff]  ;;  %v66_v13 = vld [vmem:[#allocation2 + $0xd0] sm:$0xff]  ;;  %v141_v14 = vld [vmem:[#allocation5 + $0xd0] sm:$0xff] }
  0x3a   :  { %287 = vst [vmem:[#allocation7 + $0xb0] sm:$0xff] %v212_v6  ;;  %288 = vst [vmem:[#allocation7 + $0xb8] sm:$0xff] %v213_v7  ;;  %v215_v15 = vadd.f32 %v140_v12, %v65_v10  ;;  %v216_v16 = vadd.f32 %v141_v14, %v66_v13  ;;  %v67_v17 = vld [vmem:[#allocation2 + $0xd8] sm:$0xff]  ;;  %v142_v18 = vld [vmem:[#allocation5 + $0xd8] sm:$0xff] }
  0x3b   :  { %v68_v19 = vld [vmem:[#allocation2 + $0xe0] sm:$0xff]  ;;  %289 = vst [vmem:[#allocation7 + $0xc0] sm:$0xff] %v214_v11  ;;  %v217_v20 = vadd.f32 %v142_v18, %v67_v17  ;;  %v143_v21 = vld [vmem:[#allocation5 + $0xe0] sm:$0xff]  ;;  %v69_v22 = vld [vmem:[#allocation2 + $0xe8] sm:$0xff] }
  0x3c   :  { %v144_v23 = vld [vmem:[#allocation5 + $0xe8] sm:$0xff]  ;;  %290 = vst [vmem:[#allocation7 + $0xc8] sm:$0xff] %v215_v15  ;;  %291 = vst [vmem:[#allocation7 + $0xd0] sm:$0xff] %v216_v16  ;;  %v218_v24 = vadd.f32 %v143_v21, %v68_v19  ;;  %v70_v26 = vld [vmem:[#allocation2 + $0xf0] sm:$0xff] }
  0x3d   :  { %v219_v25 = vadd.f32 %v144_v23, %v69_v22  ;;  %v145_v27 = vld [vmem:[#allocation5 + $0xf0] sm:$0xff]  ;;  %v71_v28 = vld [vmem:[#allocation2 + $0xf8] sm:$0xff]  ;;  %292 = vst [vmem:[#allocation7 + $0xd8] sm:$0xff] %v217_v20  ;;  %v146_v30 = vld [vmem:[#allocation5 + $0xf8] sm:$0xff] }
  0x3e   :  { %v220_v29 = vadd.f32 %v145_v27, %v70_v26  ;;  %v72_v31 = vld [vmem:[#allocation2 + $0x100] sm:$0xff]  ;;  %v147_v32 = vld [vmem:[#allocation5 + $0x100] sm:$0xff]  ;;  %293 = vst [vmem:[#allocation7 + $0xe0] sm:$0xff] %v218_v24  ;;  %v221_v33 = vadd.f32 %v146_v30, %v71_v28  ;;  %v73_v35 = vld [vmem:[#allocation2 + $0x108] sm:$0xff] }
  0x3f   :  { %294 = vst [vmem:[#allocation7 + $0xe8] sm:$0xff] %v219_v25  ;;  %v222_v34 = vadd.f32 %v147_v32, %v72_v31  ;;  %v148_v36 = vld [vmem:[#allocation5 + $0x108] sm:$0xff]  ;;  %v74_v37 = vld [vmem:[#allocation2 + $0x110] sm:$0xff]  ;;  %v149_v39 = vld [vmem:[#allocation5 + $0x110] sm:$0xff] }
  0x40   :  { %295 = vst [vmem:[#allocation7 + $0xf0] sm:$0xff] %v220_v29  ;;  %v223_v38 = vadd.f32 %v148_v36, %v73_v35  ;;  %v75_v40 = vld [vmem:[#allocation2 + $0x118] sm:$0xff]  ;;  %v150_v41 = vld [vmem:[#allocation5 + $0x118] sm:$0xff]  ;;  %296 = vst [vmem:[#allocation7 + $0xf8] sm:$0xff] %v221_v33  ;;  %v224_v42 = vadd.f32 %v149_v39, %v74_v37 }
  0x41   :  { %297 = vst [vmem:[#allocation7 + $0x100] sm:$0xff] %v222_v34  ;;  %v225_v43 = vadd.f32 %v150_v41, %v75_v40  ;;  %v76_v44 = vld [vmem:[#allocation2 + $0x120] sm:$0xff]  ;;  %v151_v45 = vld [vmem:[#allocation5 + $0x120] sm:$0xff]  ;;  %v77_v46 = vld [vmem:[#allocation2 + $0x128] sm:$0xff] }
  0x42   :  { %298 = vst [vmem:[#allocation7 + $0x108] sm:$0xff] %v223_v38  ;;  %v226_v47 = vadd.f32 %v151_v45, %v76_v44  ;;  %v152_v48 = vld [vmem:[#allocation5 + $0x128] sm:$0xff]  ;;  %v78_v49 = vld [vmem:[#allocation2 + $0x130] sm:$0xff]  ;;  %v153_v50 = vld [vmem:[#allocation5 + $0x130] sm:$0xff] }
  0x43   :  { %299 = vst [vmem:[#allocation7 + $0x110] sm:$0xff] %v224_v42  ;;  %300 = vst [vmem:[#allocation7 + $0x118] sm:$0xff] %v225_v43  ;;  %v227_v51 = vadd.f32 %v152_v48, %v77_v46  ;;  %v228_v52 = vadd.f32 %v153_v50, %v78_v49  ;;  %v79_v53 = vld [vmem:[#allocation2 + $0x138] sm:$0xff]  ;;  %v154_v54 = vld [vmem:[#allocation5 + $0x138] sm:$0xff] }
  0x44   :  { %v80_v55 = vld [vmem:[#allocation2 + $0x140] sm:$0xff]  ;;  %301 = vst [vmem:[#allocation7 + $0x120] sm:$0xff] %v226_v47  ;;  %v229_v56 = vadd.f32 %v154_v54, %v79_v53  ;;  %v155_v57 = vld [vmem:[#allocation5 + $0x140] sm:$0xff]  ;;  %v81_v58 = vld [vmem:[#allocation2 + $0x148] sm:$0xff] }
  0x45   :  { %v156_v59 = vld [vmem:[#allocation5 + $0x148] sm:$0xff]  ;;  %302 = vst [vmem:[#allocation7 + $0x128] sm:$0xff] %v227_v51  ;;  %303 = vst [vmem:[#allocation7 + $0x130] sm:$0xff] %v228_v52  ;;  %v230_v60 = vadd.f32 %v155_v57, %v80_v55  ;;  %v82_v62 = vld [vmem:[#allocation2 + $0x150] sm:$0xff] }
  0x46   :  { %v231_v61 = vadd.f32 %v156_v59, %v81_v58  ;;  %v157_v63 = vld [vmem:[#allocation5 + $0x150] sm:$0xff]  ;;  %v83_v0 = vld [vmem:[#allocation2 + $0x158] sm:$0xff]  ;;  %304 = vst [vmem:[#allocation7 + $0x138] sm:$0xff] %v229_v56  ;;  %v158_v2 = vld [vmem:[#allocation5 + $0x158] sm:$0xff] }
  0x47   :  { %v232_v1 = vadd.f32 %v157_v63, %v82_v62  ;;  %v84_v3 = vld [vmem:[#allocation2 + $0x160] sm:$0xff]  ;;  %v159_v4 = vld [vmem:[#allocation5 + $0x160] sm:$0xff]  ;;  %305 = vst [vmem:[#allocation7 + $0x140] sm:$0xff] %v230_v60  ;;  %v233_v5 = vadd.f32 %v158_v2, %v83_v0  ;;  %v85_v7 = vld [vmem:[#allocation2 + $0x168] sm:$0xff] }
  0x48   :  { %306 = vst [vmem:[#allocation7 + $0x148] sm:$0xff] %v231_v61  ;;  %v234_v6 = vadd.f32 %v159_v4, %v84_v3  ;;  %v160_v8 = vld [vmem:[#allocation5 + $0x168] sm:$0xff]  ;;  %v86_v9 = vld [vmem:[#allocation2 + $0x170] sm:$0xff]  ;;  %v161_v11 = vld [vmem:[#allocation5 + $0x170] sm:$0xff] }
  0x49   :  { %307 = vst [vmem:[#allocation7 + $0x150] sm:$0xff] %v232_v1  ;;  %v235_v10 = vadd.f32 %v160_v8, %v85_v7  ;;  %v87_v12 = vld [vmem:[#allocation2 + $0x178] sm:$0xff]  ;;  %v162_v13 = vld [vmem:[#allocation5 + $0x178] sm:$0xff]  ;;  %308 = vst [vmem:[#allocation7 + $0x158] sm:$0xff] %v233_v5  ;;  %v236_v14 = vadd.f32 %v161_v11, %v86_v9 }
  0x4a   :  { %309 = vst [vmem:[#allocation7 + $0x160] sm:$0xff] %v234_v6  ;;  %v237_v15 = vadd.f32 %v162_v13, %v87_v12  ;;  %v88_v16 = vld [vmem:[#allocation2 + $0x180] sm:$0xff]  ;;  %v163_v17 = vld [vmem:[#allocation5 + $0x180] sm:$0xff]  ;;  %v89_v18 = vld [vmem:[#allocation2 + $0x188] sm:$0xff] }
  0x4b   :  { %310 = vst [vmem:[#allocation7 + $0x168] sm:$0xff] %v235_v10  ;;  %v238_v19 = vadd.f32 %v163_v17, %v88_v16  ;;  %v164_v20 = vld [vmem:[#allocation5 + $0x188] sm:$0xff]  ;;  %v90_v21 = vld [vmem:[#allocation2 + $0x190] sm:$0xff]  ;;  %v165_v22 = vld [vmem:[#allocation5 + $0x190] sm:$0xff] }
  0x4c   :  { %311 = vst [vmem:[#allocation7 + $0x170] sm:$0xff] %v236_v14  ;;  %312 = vst [vmem:[#allocation7 + $0x178] sm:$0xff] %v237_v15  ;;  %v239_v23 = vadd.f32 %v164_v20, %v89_v18  ;;  %v240_v24 = vadd.f32 %v165_v22, %v90_v21  ;;  %v91_v25 = vld [vmem:[#allocation2 + $0x198] sm:$0xff]  ;;  %v166_v26 = vld [vmem:[#allocation5 + $0x198] sm:$0xff] }
  0x4d   :  { %v92_v27 = vld [vmem:[#allocation2 + $0x1a0] sm:$0xff]  ;;  %313 = vst [vmem:[#allocation7 + $0x180] sm:$0xff] %v238_v19  ;;  %v241_v28 = vadd.f32 %v166_v26, %v91_v25  ;;  %v167_v29 = vld [vmem:[#allocation5 + $0x1a0] sm:$0xff]  ;;  %v93_v30 = vld [vmem:[#allocation2 + $0x1a8] sm:$0xff] }
  0x4e   :  { %v168_v31 = vld [vmem:[#allocation5 + $0x1a8] sm:$0xff]  ;;  %314 = vst [vmem:[#allocation7 + $0x188] sm:$0xff] %v239_v23  ;;  %315 = vst [vmem:[#allocation7 + $0x190] sm:$0xff] %v240_v24  ;;  %v242_v32 = vadd.f32 %v167_v29, %v92_v27  ;;  %v94_v34 = vld [vmem:[#allocation2 + $0x1b0] sm:$0xff] }
  0x4f   :  { %v243_v33 = vadd.f32 %v168_v31, %v93_v30  ;;  %v169_v35 = vld [vmem:[#allocation5 + $0x1b0] sm:$0xff]  ;;  %v95_v36 = vld [vmem:[#allocation2 + $0x1b8] sm:$0xff]  ;;  %316 = vst [vmem:[#allocation7 + $0x198] sm:$0xff] %v241_v28  ;;  %v170_v38 = vld [vmem:[#allocation5 + $0x1b8] sm:$0xff] }
  0x50   :  { %v244_v37 = vadd.f32 %v169_v35, %v94_v34  ;;  %v96_v39 = vld [vmem:[#allocation2 + $0x1c0] sm:$0xff]  ;;  %v171_v40 = vld [vmem:[#allocation5 + $0x1c0] sm:$0xff]  ;;  %317 = vst [vmem:[#allocation7 + $0x1a0] sm:$0xff] %v242_v32  ;;  %v245_v41 = vadd.f32 %v170_v38, %v95_v36  ;;  %v97_v43 = vld [vmem:[#allocation2 + $0x1c8] sm:$0xff] }
  0x51   :  { %318 = vst [vmem:[#allocation7 + $0x1a8] sm:$0xff] %v243_v33  ;;  %v246_v42 = vadd.f32 %v171_v40, %v96_v39  ;;  %v172_v44 = vld [vmem:[#allocation5 + $0x1c8] sm:$0xff]  ;;  %v98_v45 = vld [vmem:[#allocation2 + $0x1d0] sm:$0xff]  ;;  %v173_v47 = vld [vmem:[#allocation5 + $0x1d0] sm:$0xff] }
  0x52   :  { %319 = vst [vmem:[#allocation7 + $0x1b0] sm:$0xff] %v244_v37  ;;  %v247_v46 = vadd.f32 %v172_v44, %v97_v43  ;;  %v99_v48 = vld [vmem:[#allocation2 + $0x1d8] sm:$0xff]  ;;  %v174_v49 = vld [vmem:[#allocation5 + $0x1d8] sm:$0xff]  ;;  %320 = vst [vmem:[#allocation7 + $0x1b8] sm:$0xff] %v245_v41  ;;  %v248_v50 = vadd.f32 %v173_v47, %v98_v45 }
  0x53   :  { %321 = vst [vmem:[#allocation7 + $0x1c0] sm:$0xff] %v246_v42  ;;  %v249_v51 = vadd.f32 %v174_v49, %v99_v48  ;;  %v100_v52 = vld [vmem:[#allocation2 + $0x1e0] sm:$0xff]  ;;  %v175_v53 = vld [vmem:[#allocation5 + $0x1e0] sm:$0xff]  ;;  %v101_v54 = vld [vmem:[#allocation2 + $0x1e8] sm:$0xff] }
  0x54   :  { %322 = vst [vmem:[#allocation7 + $0x1c8] sm:$0xff] %v247_v46  ;;  %v250_v55 = vadd.f32 %v175_v53, %v100_v52  ;;  %v176_v56 = vld [vmem:[#allocation5 + $0x1e8] sm:$0xff]  ;;  %v102_v57 = vld [vmem:[#allocation2 + $0x1f0] sm:$0xff]  ;;  %v177_v58 = vld [vmem:[#allocation5 + $0x1f0] sm:$0xff] }
  0x55   :  { %323 = vst [vmem:[#allocation7 + $0x1d0] sm:$0xff] %v248_v50  ;;  %324 = vst [vmem:[#allocation7 + $0x1d8] sm:$0xff] %v249_v51  ;;  %v251_v59 = vadd.f32 %v176_v56, %v101_v54  ;;  %v252_v60 = vadd.f32 %v177_v58, %v102_v57  ;;  %v103_v61 = vld [vmem:[#allocation2 + $0x1f8] sm:$0xff]  ;;  %v178_v62 = vld [vmem:[#allocation5 + $0x1f8] sm:$0xff] }
  0x56   :  { %v104_v63 = vld [vmem:[#allocation2 + $0x200] sm:$0xff]  ;;  %325 = vst [vmem:[#allocation7 + $0x1e0] sm:$0xff] %v250_v55  ;;  %v253_v0 = vadd.f32 %v178_v62, %v103_v61  ;;  %v179_v1 = vld [vmem:[#allocation5 + $0x200] sm:$0xff]  ;;  %v105_v2 = vld [vmem:[#allocation2 + $0x208] sm:$0xff] }
  0x57   :  { %v180_v3 = vld [vmem:[#allocation5 + $0x208] sm:$0xff]  ;;  %326 = vst [vmem:[#allocation7 + $0x1e8] sm:$0xff] %v251_v59  ;;  %327 = vst [vmem:[#allocation7 + $0x1f0] sm:$0xff] %v252_v60  ;;  %v254_v4 = vadd.f32 %v179_v1, %v104_v63  ;;  %v106_v6 = vld [vmem:[#allocation2 + $0x210] sm:$0xff] }
  0x58   :  { %v255_v5 = vadd.f32 %v180_v3, %v105_v2  ;;  %v181_v7 = vld [vmem:[#allocation5 + $0x210] sm:$0xff]  ;;  %v107_v8 = vld [vmem:[#allocation2 + $0x218] sm:$0xff]  ;;  %328 = vst [vmem:[#allocation7 + $0x1f8] sm:$0xff] %v253_v0  ;;  %v182_v10 = vld [vmem:[#allocation5 + $0x218] sm:$0xff] }
  0x59   :  { %v256_v9 = vadd.f32 %v181_v7, %v106_v6  ;;  %v108_v11 = vld [vmem:[#allocation2 + $0x220] sm:$0xff]  ;;  %v183_v12 = vld [vmem:[#allocation5 + $0x220] sm:$0xff]  ;;  %329 = vst [vmem:[#allocation7 + $0x200] sm:$0xff] %v254_v4  ;;  %v257_v13 = vadd.f32 %v182_v10, %v107_v8  ;;  %v109_v15 = vld [vmem:[#allocation2 + $0x228] sm:$0xff] }
  0x5a   :  { %330 = vst [vmem:[#allocation7 + $0x208] sm:$0xff] %v255_v5  ;;  %v258_v14 = vadd.f32 %v183_v12, %v108_v11  ;;  %v184_v16 = vld [vmem:[#allocation5 + $0x228] sm:$0xff]  ;;  %v110_v17 = vld [vmem:[#allocation2 + $0x230] sm:$0xff]  ;;  %v185_v19 = vld [vmem:[#allocation5 + $0x230] sm:$0xff] }
  0x5b   :  { %331 = vst [vmem:[#allocation7 + $0x210] sm:$0xff] %v256_v9  ;;  %v259_v18 = vadd.f32 %v184_v16, %v109_v15  ;;  %v111_v20 = vld [vmem:[#allocation2 + $0x238] sm:$0xff]  ;;  %v186_v21 = vld [vmem:[#allocation5 + $0x238] sm:$0xff]  ;;  %332 = vst [vmem:[#allocation7 + $0x218] sm:$0xff] %v257_v13  ;;  %v260_v22 = vadd.f32 %v185_v19, %v110_v17 }
  0x5c   :  { %333 = vst [vmem:[#allocation7 + $0x220] sm:$0xff] %v258_v14  ;;  %v261_v23 = vadd.f32 %v186_v21, %v111_v20  ;;  %v112_v24 = vld [vmem:[#allocation2 + $0x240] sm:$0xf]  ;;  %v187_v25 = vld [vmem:[#allocation5 + $0x240] sm:$0xf] }
  0x5d   :  { %v113_v26 = vld [vmem:[#allocation2 + $0x248] sm:$0xf]  ;;  %334 = vst [vmem:[#allocation7 + $0x228] sm:$0xff] %v259_v18  ;;  %v262_v27 = vadd.f32 %v187_v25, %v112_v24  ;;  %v188_v28 = vld [vmem:[#allocation5 + $0x248] sm:$0xf]  ;;  %335 = vst [vmem:[#allocation7 + $0x230] sm:$0xff] %v260_v22 }
  0x5e   :  { %v114_v29 = vld [vmem:[#allocation2 + $0x250] sm:$0xf]  ;;  %v189_v30 = vld [vmem:[#allocation5 + $0x250] sm:$0xf]  ;;  %336 = vst [vmem:[#allocation7 + $0x238] sm:$0xff] %v261_v23  ;;  %v263_v31 = vadd.f32 %v188_v28, %v113_v26 }
  0x5f   :  { %v264_v32 = vadd.f32 %v189_v30, %v114_v29  ;;  %337 = vst [vmem:[#allocation7 + $0x240] sm:$0xf] %v262_v27 }
  0x60   :  { %338 = vst [vmem:[#allocation7 + $0x248] sm:$0xf] %v263_v31 }
  0x61   :  { %339 = vst [vmem:[#allocation7 + $0x250] sm:$0xf] %v264_v32 }
  0x62   :  { %418 = shalt.err (!%p415_p6)
}
  0x63   :  { %s419_s10 = scalar_lea.hbm %s502_s2, 9600 }
  0x64   :  { %p420_p7 = scmp.ne.s32.totalorder %s502_s2, %s419_s10  ;;  %p423_p8 = scmp.lt.u32.totalorder %s419_s10, %s502_s2 }
  0x66   :  { %p425_p9 = pnand %p423_p8, %p420_p7 }
  0x68   :  { %428 = shalt.err (!%p425_p9)
}
  0x69   :  { %351 = dma.vmem_to_hbm [thread:$0]  %s346_s6, 9600, %s502_s2, [#allocation4], %s436_s19, %s436_s19, %s437_s20  }
  0x6a   :  { %433 = dma.done.wait [#allocation4], 9600  }
  0x6b   :  { %434 = vsyncadd [#allocation4], 4294957696 }
  0x6c   :  { %355 = vsyncpa [#allocation3], 1 }
  0x6d   :  { %356 = vsyncpa [#allocation6], 1 }
  0x6e   :  { %357 = vsyncpa [#allocation4], 1 }

</bundles_post_ra>
